<compile_context>
chip_gen: v6e
topology: v6e:2x2x1
jax: 0.10.0
libtpu: 0.0.40
codegen_flags: <defaults>
</compile_context>

<pallas_src>
import functools
import math

import jax
import jax.numpy as jnp
from jax.experimental import pallas as pl
from jax.experimental.pallas import tpu as pltpu

BN_EPS = 1e-5

# 728-wide channel groups are zero-padded to 768 (multiple of 128) at parameter-init
# time so every matmul / depthwise operand is lane aligned.  The padded channels carry
# exact zeros through the whole network (zero weight rows/cols, zero BN shift), so the
# math on the real 728 channels is unchanged.
_CH_PAD = {728: 768}

_MM_VMEM_BUDGET = 24 * 1024 * 1024   # working-set budget used when picking tn
_MM_VMEM_LIMIT = 40 * 1024 * 1024    # scoped VMEM limit for the matmul kernels
_DW_TILE_BYTES = 2 * 1024 * 1024     # bf16 body-tile byte cap for the depthwise kernel
_DW_VMEM_LIMIT = 48 * 1024 * 1024    # scoped VMEM limit for the depthwise kernels


def _pc(c):
    return _CH_PAD.get(c, c)


def _round_up(v, m):
    return ((v + m - 1) // m) * m


# ----------------------------------------------------------------------------
# Pallas kernel 1: matmul with fused shift (+ optional residual add, ReLU)
#                  (BN scale is pre-folded into the bf16 weights)
# ----------------------------------------------------------------------------
def _matmul_kernel(x_ref, w_ref, b_ref, o_ref, *, relu):
    acc = jnp.dot(x_ref[...], w_ref[...], preferred_element_type=jnp.float32)
    y = acc + b_ref[...]
    if relu:
        y = jnp.maximum(y, 0.0)
    o_ref[...] = y.astype(o_ref.dtype)


def _matmul_add_kernel(x_ref, w_ref, b_ref, a_ref, o_ref, *, relu):
    acc = jnp.dot(x_ref[...], w_ref[...], preferred_element_type=jnp.float32)
    y = acc + b_ref[...] + a_ref[...].astype(jnp.float32)
    if relu:
        y = jnp.maximum(y, 0.0)
    o_ref[...] = y.astype(o_ref.dtype)


@functools.lru_cache(maxsize=None)
def _build_matmul(Mp, Kp, Np, tm, tn, relu, has_add, out_dtype_name):
    out_dtype = jnp.dtype(out_dtype_name)
    grid = (Np // tn, Mp // tm)  # (j, i): i innermost -> weight tile stays resident
    in_specs = [
        pl.BlockSpec((tm, Kp), lambda j, i: (i, 0)),   # activations, single K tile
        pl.BlockSpec((Kp, tn), lambda j, i: (0, j)),   # weights (bf16, BN-scale folded)
        pl.BlockSpec((1, tn), lambda j, i: (0, j)),    # shift (f32)
    ]
    if has_add:
        in_specs.append(pl.BlockSpec((tm, tn), lambda j, i: (i, j)))  # residual
        kern = functools.partial(_matmul_add_kernel, relu=relu)
    else:
        kern = functools.partial(_matmul_kernel, relu=relu)
    f = pl.pallas_call(
        kern,
        out_shape=jax.ShapeDtypeStruct((Mp, Np), out_dtype),
        grid_spec=pltpu.PrefetchScalarGridSpec(
            num_scalar_prefetch=0,
            grid=grid,
            in_specs=in_specs,
            out_specs=pl.BlockSpec((tm, tn), lambda j, i: (i, j)),
        ),
        compiler_params=pltpu.CompilerParams(
            dimension_semantics=("parallel", "parallel"),
            vmem_limit_bytes=_MM_VMEM_LIMIT),
    )
    return jax.jit(f)


def _pick_tn(Kp, N, tm, has_add):
    """Widest lane-aligned N tile whose (double-buffered) working set fits the budget.

    With tn == N the weight is loaded once and the activation streamed exactly once.
    """
    if N % 128 != 0:
        return N                       # small ragged N (stem 32/64): single full tile
    for tn in (N, 1024, 768, 512, 384, 256, 128):
        if tn > N or N % tn:
            continue
        est = (2 * 2 * (tm * Kp + Kp * tn + tm * tn * (2 if has_add else 1))
               + 2 * 4 * tn)
        if est <= _MM_VMEM_BUDGET:
            return tn
    return 128


def matmul_affine(x, w, shift, relu=False, add=None):
    """y = relu?( x @ w + shift (+ add) ).  x:(M,K), w:(K,N) bf16 (BN scale folded)."""
    M, K = x.shape
    Kw, N = w.shape
    assert K == Kw, (K, Kw)
    Kp = _round_up(K, 8)                # single full-K tile (only conv1's K=27 pads)
    tm = 256 if M > 256 else 128
    Mp = _round_up(M, tm)
    has_add = add is not None
    tn = _pick_tn(Kp, N, tm, has_add)

    xp = x.astype(jnp.bfloat16)
    if Mp != M or Kp != K:
        # TODO(synk): handling the ragged last M tile inside the kernel (masked
        # boundary block) would remove this whole-activation pad copy.
        xp = jnp.pad(xp, ((0, Mp - M), (0, Kp - K)))
    wp = w.astype(jnp.bfloat16)
    if Kp != K:
        wp = jnp.pad(wp, ((0, Kp - K), (0, 0)))
    bp = shift.reshape(1, N).astype(jnp.float32)

    args = [xp, wp, bp]
    if has_add:
        ap = add
        if Mp != M:
            ap = jnp.pad(ap, ((0, Mp - M), (0, 0)))
        args.append(ap)

    out = _build_matmul(Mp, Kp, N, tm, tn, bool(relu), has_add, "bfloat16")(*args)
    if Mp != M:
        out = out[:M]
    return out


# ----------------------------------------------------------------------------
# Pallas kernel 2: depthwise 3x3 (dilated) conv, stride 1, "same" fixed padding
#                  tiled over (batch, channel tiles, output-row tiles) with halo
#                  (no staging scratch: taps are read straight off the input block)
# ----------------------------------------------------------------------------
def _depthwise_kernel(xa_ref, xb_ref, w_ref, o_ref, *, dilation):
    d = dilation
    th = o_ref.shape[1]
    wout = o_ref.shape[2]
    ct = o_ref.shape[3]

    def accum(nrows, row_src):
        # row_src(kh) -> (ref, start_row): tap kh reads rows [start, start+nrows).
        acc = jnp.zeros((nrows, wout, ct), jnp.float32)
        for kh in range(3):
            ref, r0 = row_src(kh)
            for kw in range(3):
                p = ref[0, r0:r0 + nrows, kw * d:kw * d + wout, :]
                acc = acc + p.astype(jnp.float32) * w_ref[kh, kw, :]
        return acc.astype(o_ref.dtype)

    hm = th - 2 * d
    # main rows: every tap stays inside the body block
    if hm > 0:
        o_ref[0, 0:hm] = accum(hm, lambda kh: (xa_ref, kh * d))
    # last 2*d output rows: taps straddle the body tail and the halo block
    o_ref[0, hm:hm + d] = accum(
        d, lambda kh: (xa_ref, hm + kh * d) if kh < 2 else (xb_ref, 0))
    o_ref[0, hm + d:th] = accum(
        d, lambda kh: (xa_ref, hm + d) if kh == 0 else (xb_ref, (kh - 1) * d))


@functools.lru_cache(maxsize=None)
def _build_depthwise(N, Hin, Wpad, C, Hout_p, Wout, Ct, th, d):
    hb = 2 * d                 # halo rows; th is a multiple of hb by construction
    step_b = th // hb
    kern = functools.partial(_depthwise_kernel, dilation=d)
    f = pl.pallas_call(
        kern,
        out_shape=jax.ShapeDtypeStruct((N, Hout_p, Wout, C), jnp.bfloat16),
        grid_spec=pltpu.PrefetchScalarGridSpec(
            num_scalar_prefetch=0,
            grid=(N, C // Ct, Hout_p // th),
            in_specs=[
                pl.BlockSpec((1, th, Wpad, Ct), lambda n, c, h: (n, h, 0, c)),
                pl.BlockSpec((1, hb, Wpad, Ct),
                             lambda n, c, h: (n, (h + 1) * step_b, 0, c)),
                pl.BlockSpec((3, 3, Ct), lambda n, c, h: (0, 0, c)),
            ],
            out_specs=pl.BlockSpec((1, th, Wout, Ct), lambda n, c, h: (n, h, 0, c)),
        ),
        compiler_params=pltpu.CompilerParams(
            dimension_semantics=("parallel", "parallel", "arbitrary"),
            vmem_limit_bytes=_DW_VMEM_LIMIT),
    )
    return jax.jit(f)


def depthwise_conv_same(x, w, dilation=1):
    """x:(N,H,W,C), w:(3,3,C). fixed_padding + stride-1 depthwise conv (bf16 out)."""
    N, H, W, C = x.shape
    d = dilation
    Hout, Wout = H, W
    Wpad = W + 2 * d
    if C % 256 == 0:
        Ct = 256
    elif C % 128 == 0:
        Ct = 128
    else:
        Ct = C
    row_bytes = max(1, Wpad * Ct * 2)                       # bf16 body rows
    th = max(1, min(Hout, min(256, _DW_TILE_BYTES // row_bytes)))
    th = _round_up(th, max(4, 2 * d))                       # multiple of 2*dilation
    num_h = -(-Hout // th)
    Hout_p = num_h * th
    Hin = Hout_p + 2 * d                                    # exactly body + halo rows
    # TODO(synk): the fixed_padding halo is still materialized with a full jnp.pad
    # copy; writing the producer's output directly into a pre-padded buffer (or
    # in-kernel edge masking) would remove this extra HBM pass per depthwise layer.
    xp = jnp.pad(x.astype(jnp.bfloat16),
                 ((0, 0), (d, Hin - H - d), (d, d), (0, 0)))
    y = _build_depthwise(N, Hin, Wpad, C, Hout_p, Wout, Ct, th, d)(xp, xp, w)
    if Hout_p != Hout:
        y = y[:, :Hout]
    return y


# ----------------------------------------------------------------------------
# conv building blocks (JAX glue around the Pallas kernels)
# ----------------------------------------------------------------------------
def pointwise_conv(x, pw, relu=False, add=None):
    N, H, W, C = x.shape
    Cout = pw["w"].shape[1]
    add2 = None if add is None else add.reshape(N * H * W, Cout)
    y = matmul_affine(x.reshape(N * H * W, C), pw["w"], pw["b"], relu=relu, add=add2)
    return y.reshape(N, H, W, Cout)


def separable_conv_same(x, w_dw, pw, stride=1, dilation=1, relu_after=False, add=None):
    y = depthwise_conv_same(x, w_dw, dilation=dilation)
    if stride != 1:
        # TODO(synk): direct strided depthwise output (compute only needed rows/cols)
        # is not implemented; stride-1 conv + subsample is mathematically identical.
        y = y[:, ::stride, ::stride, :]
    return pointwise_conv(y, pw, relu=relu_after, add=add)


def conv2d_3x3(x, p, stride, relu):
    """Standard 3x3 conv, padding=1, via bf16 im2col + Pallas matmul (stem only)."""
    # TODO(synk): a direct stem conv kernel (in-kernel patch construction, no im2col
    # HBM round-trip, lane-dense 128-padded outputs) is not implemented.
    N, H, W, Cin = x.shape
    w = p["w"]                                  # (9*Cin, Cout) bf16, BN scale folded
    Cout = w.shape[1]
    xp = jnp.pad(x, ((0, 0), (1, 1), (1, 1), (0, 0))).astype(jnp.bfloat16)
    Hout = (H + 2 - 3) // stride + 1
    Wout = (W + 2 - 3) // stride + 1
    cols = []
    for kh in range(3):
        for kw in range(3):
            cols.append(xp[:, kh:kh + stride * (Hout - 1) + 1:stride,
                           kw:kw + stride * (Wout - 1) + 1:stride, :])
    patches = jnp.stack(cols, axis=3).reshape(N * Hout * Wout, 9 * Cin)
    y = matmul_affine(patches, w, p["b"], relu=relu)
    return y.reshape(N, Hout, Wout, Cout)


# ----------------------------------------------------------------------------
# parameter initialization (matches _init_weight shapes/distributions)
# ----------------------------------------------------------------------------
class ParamGen:
    def __init__(self, seed=0):
        self.key = jax.random.PRNGKey(seed)

    def normal(self, shape, std):
        self.key, sub = jax.random.split(self.key)
        return std * jax.random.normal(sub, shape, jnp.float32)


def bn_affine(c):
    """Inference-mode SynchronizedBatchNorm2d with _init_weight's deterministic init."""
    cp = _pc(c)
    gamma = jnp.ones((cp,), jnp.float32)
    beta = jnp.zeros((cp,), jnp.float32)
    mean = jnp.zeros((cp,), jnp.float32)
    var = jnp.ones((cp,), jnp.float32)
    scale = gamma / jnp.sqrt(var + BN_EPS)
    shift = beta - mean * scale
    return scale, shift


def fold_pw(w, bn):
    """Fold the following BN's per-channel scale into a (K,N) weight; keep the shift."""
    n = w.shape[1]
    if bn is None:
        return dict(w=w.astype(jnp.bfloat16), b=jnp.zeros((n,), jnp.float32))
    scale, shift = bn
    return dict(w=(w * scale[None, :]).astype(jnp.bfloat16),
                b=shift.astype(jnp.float32))


def init_sep(pg, cin, cout):
    # depthwise: out_channels = cin, kernel 3x3 -> n = 9*cin ; pointwise: n = cout
    w_dw = pg.normal((3, 3, cin), math.sqrt(2.0 / (9 * cin)))
    w_pw = pg.normal((cin, cout), math.sqrt(2.0 / cout))
    if _pc(cin) != cin:
        w_dw = jnp.pad(w_dw, ((0, 0), (0, 0), (0, _pc(cin) - cin)))
        w_pw = jnp.pad(w_pw, ((0, _pc(cin) - cin), (0, 0)))
    if _pc(cout) != cout:
        w_pw = jnp.pad(w_pw, ((0, 0), (0, _pc(cout) - cout)))
    return w_dw, w_pw


def init_block(pg, inplanes, planes, reps, stride, dilation,
               start_with_relu, grow_first, is_last):
    units = []
    if grow_first:
        units.append((inplanes, planes, dilation))
        filters = planes
    else:
        filters = inplanes
    for _ in range(reps - 1):
        units.append((filters, filters, dilation))
    if not grow_first:
        units.append((inplanes, planes, dilation))

    p = dict(units=[], trailing=None, skip=None)
    for (cin, cout, d) in units:
        w_dw, w_pw = init_sep(pg, cin, cout)
        p["units"].append(dict(dw=w_dw, pw=fold_pw(w_pw, bn_affine(cout)), dilation=d))
    if stride != 1 or is_last:
        # trailing SeparableConv2d_same: no ReLU before it, no BN after it (reference).
        w_dw, w_pw = init_sep(pg, planes, planes)
        p["trailing"] = dict(dw=w_dw, pw=fold_pw(w_pw, None),
                             stride=(stride if stride != 1 else 1))
    if planes != inplanes or stride != 1:
        w = pg.normal((inplanes, planes), math.sqrt(2.0 / planes))
        if _pc(inplanes) != inplanes:
            w = jnp.pad(w, ((0, _pc(inplanes) - inplanes), (0, 0)))
        if _pc(planes) != planes:
            w = jnp.pad(w, ((0, 0), (0, _pc(planes) - planes)))
        p["skip"] = dict(pw=fold_pw(w, bn_affine(planes)), stride=stride)
    return p


def init_xception(seed=0, inplanes=3, os=16):
    assert os == 16
    entry_block3_stride, mid_d, exit_d = 2, 1, (1, 2)
    pg = ParamGen(seed)
    params = {}
    w1 = pg.normal((3, 3, inplanes, 32), math.sqrt(2.0 / (9 * 32)))
    s1, b1 = bn_affine(32)
    params["conv1"] = dict(w=(w1 * s1).reshape(9 * inplanes, 32).astype(jnp.bfloat16),
                           b=b1)
    w2 = pg.normal((3, 3, 32, 64), math.sqrt(2.0 / (9 * 64)))
    s2, b2 = bn_affine(64)
    params["conv2"] = dict(w=(w2 * s2).reshape(9 * 32, 64).astype(jnp.bfloat16), b=b2)

    params["block1"] = init_block(pg, 64, 128, 2, 2, 1, False, True, False)
    params["block2"] = init_block(pg, 128, 256, 2, 2, 1, True, True, False)
    params["block3"] = init_block(pg, 256, 728, 2, entry_block3_stride, 1,
                                  True, True, True)
    for i in range(4, 20):
        params[f"block{i}"] = init_block(pg, 728, 728, 3, 1, mid_d, True, True, False)
    params["block20"] = init_block(pg, 728, 1024, 2, 1, exit_d[0], True, False, True)

    for name, cin, cout in (("conv3", 1024, 1536), ("conv4", 1536, 1536),
                            ("conv5", 1536, 2048)):
        w_dw, w_pw = init_sep(pg, cin, cout)
        params[name] = dict(dw=w_dw, pw=fold_pw(w_pw, bn_affine(cout)))
    return params


# ----------------------------------------------------------------------------
# forward pass
# ----------------------------------------------------------------------------
def block_forward(x, p, relu_out):
    # The PyTorch Block starts `rep` with nn.ReLU(inplace=True), which mutates the
    # block input so the skip path also sees the ReLU'd tensor.  That leading ReLU is
    # fused into the *previous* layer's matmul epilogue (relu_out=True upstream), and
    # the ReLUs between units are fused into each unit's own pointwise epilogue, so no
    # standalone ReLU pass (and no depthwise pre-ReLU) is ever issued.
    inp = x

    # skip path first so the residual add can be fused into the final matmul
    if p["skip"] is not None:
        s = p["skip"]
        xs = inp if s["stride"] == 1 else inp[:, ::s["stride"], ::s["stride"], :]
        skip = pointwise_conv(xs, s["pw"])
    else:
        skip = inp

    h = inp
    n_units = len(p["units"])
    has_trailing = p["trailing"] is not None
    for idx, u in enumerate(p["units"]):
        last_unit = idx == n_units - 1
        if not last_unit:
            ra, addv = True, None        # ReLU between units, fused here
        elif has_trailing:
            ra, addv = False, None       # reference: no ReLU/BN before trailing conv
        else:
            ra, addv = relu_out, skip    # fused residual add (+ next block's ReLU)
        h = separable_conv_same(h, u["dw"], u["pw"], stride=1,
                                dilation=u["dilation"], relu_after=ra, add=addv)
    if has_trailing:
        t = p["trailing"]
        h = separable_conv_same(h, t["dw"], t["pw"], stride=t["stride"], dilation=1,
                                relu_after=relu_out, add=skip)
    return h


def xception_forward(x_nchw, params):
    # NCHW -> NHWC
    x = jnp.transpose(x_nchw, (0, 2, 3, 1)).astype(jnp.float32)

    x = conv2d_3x3(x, params["conv1"], 2, relu=True)
    x = conv2d_3x3(x, params["conv2"], 1, relu=True)

    # blocks 1..19 get the next block's in-place ReLU fused into their output;
    # block20's output is consumed by conv3 with no ReLU in between.
    x = block_forward(x, params["block1"], relu_out=True)
    low_level_feat = x          # reference aliasing: block2's in-place ReLU hits this
    for i in range(2, 20):
        x = block_forward(x, params[f"block{i}"], relu_out=True)
    x = block_forward(x, params["block20"], relu_out=False)

    for name in ("conv3", "conv4", "conv5"):
        sp = params[name]
        x = separable_conv_same(x, sp["dw"], sp["pw"], stride=1, dilation=2,
                                relu_after=True)

    # NHWC -> NCHW (match PyTorch output convention)
    out = jnp.transpose(x, (0, 3, 1, 2)).astype(jnp.float32)
    llf = jnp.transpose(low_level_feat, (0, 3, 1, 2)).astype(jnp.float32)
    return out, llf


# ----------------------------------------------------------------------------
if __name__ == "__main__":
    key = jax.random.PRNGKey(0)
    N, C, H, W = 2, 3, 32, 32
    x = jax.random.normal(key, (N, C, H, W), jnp.float32)

    params = init_xception(seed=0, inplanes=C, os=16)
    out, low_level_feat = xception_forward(x, params)
    jax.block_until_ready(out)
    jax.block_until_ready(low_level_feat)

    assert out.shape == (N, 2048, H // 16, W // 16), out.shape
    assert low_level_feat.shape == (N, 128, H // 4, W // 4), low_level_feat.shape
    print("KERNEL_OK")
</pallas_src>

<mosaic_0001>
module attributes {stable_mosaic.version = 11 : i64} {
  func.func @_matmul_kernel(%arg0: i32, %arg1: i32, %arg2: memref<256x32xbf16, #tpu.memory_space<vmem>>, %arg3: memref<32x32xbf16, #tpu.memory_space<vmem>>, %arg4: memref<1x32xf32, #tpu.memory_space<vmem>>, %arg5: memref<256x32xbf16, #tpu.memory_space<vmem>>) attributes {dimension_semantics = [#tpu.dimension_semantics<parallel>, #tpu.dimension_semantics<parallel>], iteration_bounds = array<i64: 1, 2>, scalar_prefetch = 0 : i64, scratch_operands = 0 : i64, tpu.core_type = #tpu.core_type<tc>, window_params = [{transform_indices = @transform_0, window_bounds = array<i64: 256, 32>}, {transform_indices = @transform_1, window_bounds = array<i64: 32, 32>}, {transform_indices = @transform_2, window_bounds = array<i64: 1, 32>}, {transform_indices = @transform_3, window_bounds = array<i64: 256, 32>}]} {
    %c0 = arith.constant 0 : index
    %c0_0 = arith.constant 0 : index
    %0 = vector.load %arg2[%c0, %c0_0] : memref<256x32xbf16, #tpu.memory_space<vmem>>, vector<256x32xbf16>
    %c0_1 = arith.constant 0 : index
    %c0_2 = arith.constant 0 : index
    %1 = vector.load %arg3[%c0_1, %c0_2] : memref<32x32xbf16, #tpu.memory_space<vmem>>, vector<32x32xbf16>
    %cst = arith.constant dense<0.000000e+00> : vector<256x32xf32>
    %2 = tpu.matmul %0, %1, %cst {dimension_numbers = #tpu.dot_dimension_numbers<[1], [0], [0], [1], [0, 0, 1, 1], [], []>} : vector<256x32xbf16>, vector<32x32xbf16>, vector<256x32xf32> -> vector<256x32xf32>
    %c0_3 = arith.constant 0 : index
    %c0_4 = arith.constant 0 : index
    %3 = vector.load %arg4[%c0_3, %c0_4] : memref<1x32xf32, #tpu.memory_space<vmem>>, vector<1x32xf32>
    %4 = vector.broadcast %3 : vector<1x32xf32> to vector<256x32xf32>
    %5 = arith.addf %2, %4 : vector<256x32xf32>
    %cst_5 = arith.constant 0.000000e+00 : f32
    %6 = vector.broadcast %cst_5 : f32 to vector<256x32xf32>
    %7 = arith.maximumf %5, %6 : vector<256x32xf32>
    %8 = arith.truncf %7 : vector<256x32xf32> to vector<256x32xbf16>
    %c0_6 = arith.constant 0 : index
    %c0_7 = arith.constant 0 : index
    %9 = vector.load %arg5[%c0_6, %c0_7] : memref<256x32xbf16, #tpu.memory_space<vmem>>, vector<256x32xbf16>
    tpu.vector_store %arg5[%c0_6, %c0_7], %8 {strides = array<i32>} : memref<256x32xbf16, #tpu.memory_space<vmem>>, vector<256x32xbf16>,
    return
  }
  func.func @transform_0(%arg0: i32, %arg1: i32) -> (i32, i32) {
    %c0_i32 = arith.constant 0 : i32
    %c0_i32_0 = arith.constant 0 : i32
    return %arg1, %c0_i32 : i32, i32
  }
  func.func @transform_1(%arg0: i32, %arg1: i32) -> (i32, i32) {
    %c0_i32 = arith.constant 0 : i32
    %c0_i32_0 = arith.constant 0 : i32
    return %c0_i32, %arg0 : i32, i32
  }
  func.func @transform_2(%arg0: i32, %arg1: i32) -> (i32, i32) {
    %c0_i32 = arith.constant 0 : i32
    %c0_i32_0 = arith.constant 0 : i32
    return %c0_i32, %arg0 : i32, i32
  }
  func.func @transform_3(%arg0: i32, %arg1: i32) -> (i32, i32) {
    %c0_i32 = arith.constant 0 : i32
    return %arg1, %arg0 : i32, i32
  }
}

</mosaic_0001>

<bundles_post_ra>
// kernel: tpu_custom_call.1
= control target key start
LH: loop header
LB: loop body
LE: loop exit
PB: predicated region body
PF: predicated region fallthrough
CT: control target
= control target key end

     0   :  { %s1122_s12 = smov 0   ;;  %s1124_s13 = smov 0   ;;  %s1305_s0 = inlined_call_operand.vmem [shape: bf16[512,32], index: 0, kind: input, shape index: {}]   ;;  %s1306_s1 = inlined_call_operand.vmem [shape: bf16[32,32], index: 1, kind: input, shape index: {}]   ;;  %s1307_s2 = inlined_call_operand.vmem [shape: f32[1,32], index: 2, kind: input, shape index: {}]   ;;  %s1308_s3 = inlined_call_operand.vmem [shape: bf16[512,32], index: 3, kind: output, shape index: {}]  }
   0x1   :  { %s1126_s14 = smov 0  }
   0x2 LB: > { %s22_s15 = sadd.s32 1, %s1096_s13  ;;  %p872_p0 = scmp.ge.s32.totalorder %s1100_s14, 1  ;;  %s1100_s14 = sphi %s1126_s14, %s13_s14   ;;  %s1096_s13 = sphi %s1124_s13, %s1310_s13   ;;  %s1092_s12 = sphi %s1122_s12, %s1309_s12  }
   0x3   : > { %p23_p1 = scmp.ge.s32.totalorder %s22_s15, 2  ;;  %p169_p2 = scmp.lt.s32.totalorder %s1100_s14, 3 }
   0x5   : > { %s1312_s15 = smov (%p23_p1, %s22_s15), 0  ;;  %p170_p3 = pnand %p872_p0, %p169_p2 }
   0x6   : > { %s873_s18 = sshll.u32 (!%p170_p3), %s1092_s12, 5 }
   0x7   : > { %173 = sbr.rel (%p170_p3) target bundleno = 251 (0xfb), region = 32  ;;  %p204_p4 = scmp.lt.s32.totalorder (!%p170_p3), %s873_s18, 63 }
   0xc   : > { %v1060_v0 = vld [vmem:[%s1306_s1 + $0x8] sm:$0xff]   ;;  %v1061_v1 = vld [vmem:[%s1306_s1] sm:$0xff]   ;;  %s1314_s18 = smov (!%p204_p4, %s873_s18), 63  ;;  %vm361_vm0 = vcmask 261120   ;;  %vm731_vm1 = vcmask 257024  }
   0xd   : > { %996 = vmatprep.subr.bf16.mxu0 %v1060_v0  ;;  %1032 = vmatprep.subr.bf16.mxu1 %v1060_v0  ;;  %s874_s21 = sshll.u32 %s1314_s18, 2  ;;  %v1191_v18 = vld [vmem:[%s1307_s2] ss:$0 sm:$0xff] }
   0xe   : > { %997 = vmatpush3.bf16.msra.mxu0 %v1060_v0  ;;  %1034 = vmatpush3.bf16.msra.mxu1 %v1060_v0  ;;  %s1154_s24 = scalar_lea.vmem %s1305_s0, %s874_s21  ;;  %s1201_s29 = scalar_lea.vmem %s1308_s3, %s874_s21 }
   0xf   : > { %998 = vmatprep.subr.bf16.mxu0 %v1061_v1  ;;  %1033 = vmatprep.subr.bf16.mxu1 %v1061_v1  ;;  %v1062_v2 = vld [vmem:[%s1154_s24] sm:$0xff]   ;;  %v1064_v4 = vld [vmem:[%s1154_s24 + $0x8] sm:$0xff]   ;;  %v1066_v6 = vld [vmem:[%s1154_s24 + $0x10] sm:$0xff]  }
  0x10   : > { %v1063_v3 = vld [vmem:[%s1154_s24 + $0x40] sm:$0xff]   ;;  %1000 = vmatprep.mubr.msk.bf16.mxu0 %vm361_vm0, %v1062_v2  ;;  %v1065_v5 = vld [vmem:[%s1154_s24 + $0x48] sm:$0xff]   ;;  %v1067_v7 = vld [vmem:[%s1154_s24 + $0x50] sm:$0xff]  }
  0x11   : > { %1016 = vmatprep.mubr.msk.bf16.mxu1 %vm361_vm0, %v1063_v3  ;;  %v1068_v8 = vld [vmem:[%s1154_s24 + $0x18] sm:$0xff]   ;;  %v1070_v10 = vld [vmem:[%s1154_s24 + $0x20] sm:$0xff]   ;;  %v1072_v12 = vld [vmem:[%s1154_s24 + $0x28] sm:$0xff]  }
  0x12   : > { %999 = vmatpush3.bf16.msra.mxu0 %v1061_v1  ;;  %1035 = vmatpush3.bf16.msra.mxu1 %v1061_v1  ;;  %v1069_v9 = vld [vmem:[%s1154_s24 + $0x58] sm:$0xff]   ;;  %v1071_v11 = vld [vmem:[%s1154_s24 + $0x60] sm:$0xff]   ;;  %v1073_v13 = vld [vmem:[%s1154_s24 + $0x68] sm:$0xff]  }
  0x13   : > { %v1074_v14 = vld [vmem:[%s1154_s24 + $0x30] sm:$0xff]   ;;  %v1076_v16 = vld [vmem:[%s1154_s24 + $0x38] sm:$0xff]  }
  0x14   : > { %v1075_v15 = vld [vmem:[%s1154_s24 + $0x70] sm:$0xff]   ;;  %v1077_v17 = vld [vmem:[%s1154_s24 + $0x78] sm:$0xff]  }
  0x15   : > { %1001 = vmatmul.mubr.msk.bf16.vlgmr.msra.gmra.mxu0 %vm361_vm0, %v1064_v4  ;;  %1017 = vmatmul.mubr.msk.bf16.vlgmr.msra.gmra.mxu1 %vm361_vm0, %v1065_v5 }
  0x16   : > { %1004 = vmatprep.mubr.msk.bf16.mxu0 %vm361_vm0, %v1066_v6  ;;  %1020 = vmatprep.mubr.msk.bf16.mxu1 %vm361_vm0, %v1067_v7 }
  0x1d   : > { %1005 = vmatmul.mubr.msk.bf16.gmra.mxu0 %vm361_vm0, %v1068_v8  ;;  %1021 = vmatmul.mubr.msk.bf16.gmra.mxu1 %vm361_vm0, %v1069_v9 }
  0x1e   : > { %1008 = vmatprep.mubr.msk.bf16.mxu0 %vm361_vm0, %v1070_v10  ;;  %1024 = vmatprep.mubr.msk.bf16.mxu1 %vm361_vm0, %v1071_v11 }
  0x25   : > { %1009 = vmatmul.mubr.msk.bf16.gmra.mxu0 %vm361_vm0, %v1072_v12  ;;  %1025 = vmatmul.mubr.msk.bf16.gmra.mxu1 %vm361_vm0, %v1073_v13 }
  0x26   : > { %1012 = vmatprep.mubr.msk.bf16.mxu0 %vm361_vm0, %v1074_v14  ;;  %1028 = vmatprep.mubr.msk.bf16.mxu1 %vm361_vm0, %v1075_v15 }
  0x2d   : > { %1013 = vmatmul.mubr.msk.bf16.gmra.mxu0 %vm361_vm0, %v1076_v16  ;;  %1029 = vmatmul.mubr.msk.bf16.gmra.mxu1 %vm361_vm0, %v1077_v17 }
  0xd5   : > { %v1002_v19 = vpop.f32.mrf.mxu0  ;;  %v1018_v21 = vpop.f32.mrf.mxu1 }
  0xd6   : > { %v453_v20 = vadd.f32 %v1002_v19, %v1191_v18  ;;  %v517_v22 = vadd.f32 %v1018_v21, %v1191_v18 }
  0xd7   : > { %v444_v23 = vpop.f32.mrf.mxu0  ;;  %v508_v26 = vpop.f32.mrf.mxu1 }
  0xd8   : > { %v573_v24 = vmax.f32 %v453_v20, 0.0  ;;  %v445_v25 = vadd.f32 %v1191_v18, %v444_v23  ;;  %v589_v27 = vmax.f32 %v517_v22, 0.0  ;;  %v509_v28 = vadd.f32 %v1191_v18, %v508_v26 }
  0xd9   : > { %v1003_v29 = vpop.f32.mrf.mxu0  ;;  %v1019_v33 = vpop.f32.mrf.mxu1 }
  0xda   : > { %v948_v30 = vpack.c.bf16 %v573_v24, %v573_v24  ;;  %v571_v31 = vmax.f32 %v445_v25, 0.0  ;;  %v456_v32 = vadd.f32 %v1003_v29, %v1191_v18  ;;  %v964_v34 = vpack.c.bf16 %v589_v27, %v589_v27 }
  0xdb   : > { %v587_v35 = vmax.f32 %v509_v28, 0.0  ;;  %v520_v36 = vadd.f32 %v1019_v33, %v1191_v18  ;;  %v447_v37 = vpop.f32.mrf.mxu0  ;;  %v511_v41 = vpop.f32.mrf.mxu1 }
  0xdc   : > { %734 = vst.msk [vmem:[%s1201_s29 + $0x8] sm:$0xf] %vm731_vm1, %v948_v30  ;;  %v946_v38 = vpack.c.bf16 %v571_v31, %v571_v31  ;;  %v574_v39 = vmax.f32 %v456_v32, 0.0  ;;  %v448_v40 = vadd.f32 %v1191_v18, %v447_v37  ;;  %750 = vst.msk [vmem:[%s1201_s29 + $0x48] sm:$0xf] %vm731_vm1, %v964_v34  ;;  %v512_v44 = vadd.f32 %v1191_v18, %v511_v41 }
  0xdd   : > { %v962_v42 = vpack.c.bf16 %v587_v35, %v587_v35  ;;  %v590_v43 = vmax.f32 %v520_v36, 0.0  ;;  %v1006_v45 = vpop.f32.mrf.mxu0  ;;  %v1022_v49 = vpop.f32.mrf.mxu1 }
  0xde   : > { %732 = vst.msk [vmem:[%s1201_s29] sm:$0xf] %vm731_vm1, %v946_v38  ;;  %v949_v46 = vpack.c.bf16 %v574_v39, %v574_v39  ;;  %v572_v47 = vmax.f32 %v448_v40, 0.0  ;;  %v469_v48 = vadd.f32 %v1006_v45, %v1191_v18  ;;  %v588_v51 = vmax.f32 %v512_v44, 0.0 }
  0xdf   : > { %748 = vst.msk [vmem:[%s1201_s29 + $0x40] sm:$0xf] %vm731_vm1, %v962_v42  ;;  %v965_v50 = vpack.c.bf16 %v590_v43, %v590_v43  ;;  %v533_v52 = vadd.f32 %v1022_v49, %v1191_v18  ;;  %v460_v53 = vpop.f32.mrf.mxu0  ;;  %v524_v57 = vpop.f32.mrf.mxu1 }
  0xe0   : > { %735 = vst.msk [vmem:[%s1201_s29 + $0xc] sm:$0xf] %vm731_vm1, %v949_v46  ;;  %v947_v54 = vpack.c.bf16 %v572_v47, %v572_v47  ;;  %v577_v55 = vmax.f32 %v469_v48, 0.0  ;;  %v461_v56 = vadd.f32 %v1191_v18, %v460_v53  ;;  %v963_v58 = vpack.c.bf16 %v588_v51, %v588_v51 }
  0xe1   : > { %751 = vst.msk [vmem:[%s1201_s29 + $0x4c] sm:$0xf] %vm731_vm1, %v965_v50  ;;  %v593_v59 = vmax.f32 %v533_v52, 0.0  ;;  %v525_v60 = vadd.f32 %v1191_v18, %v524_v57  ;;  %v1007_v61 = vpop.f32.mrf.mxu0  ;;  %v1023_v1 = vpop.f32.mrf.mxu1 }
  0xe2   : > { %733 = vst.msk [vmem:[%s1201_s29 + $0x4] sm:$0xf] %vm731_vm1, %v947_v54  ;;  %v952_v62 = vpack.c.bf16 %v577_v55, %v577_v55  ;;  %v575_v63 = vmax.f32 %v461_v56, 0.0  ;;  %v472_v0 = vadd.f32 %v1007_v61, %v1191_v18  ;;  %749 = vst.msk [vmem:[%s1201_s29 + $0x44] sm:$0xf] %vm731_vm1, %v963_v58  ;;  %v536_v4 = vadd.f32 %v1023_v1, %v1191_v18 }
  0xe3   : > { %v968_v2 = vpack.c.bf16 %v593_v59, %v593_v59  ;;  %v591_v3 = vmax.f32 %v525_v60, 0.0  ;;  %v463_v5 = vpop.f32.mrf.mxu0  ;;  %v527_v9 = vpop.f32.mrf.mxu1 }
  0xe4   : > { %738 = vst.msk [vmem:[%s1201_s29 + $0x18] sm:$0xf] %vm731_vm1, %v952_v62  ;;  %v950_v6 = vpack.c.bf16 %v575_v63, %v575_v63  ;;  %v578_v7 = vmax.f32 %v472_v0, 0.0  ;;  %v464_v8 = vadd.f32 %v1191_v18, %v463_v5  ;;  %v594_v11 = vmax.f32 %v536_v4, 0.0 }
  0xe5   : > { %754 = vst.msk [vmem:[%s1201_s29 + $0x58] sm:$0xf] %vm731_vm1, %v968_v2  ;;  %v966_v10 = vpack.c.bf16 %v591_v3, %v591_v3  ;;  %v528_v12 = vadd.f32 %v1191_v18, %v527_v9  ;;  %v1010_v13 = vpop.f32.mrf.mxu0  ;;  %v1026_v17 = vpop.f32.mrf.mxu1 }
  0xe6   : > { %736 = vst.msk [vmem:[%s1201_s29 + $0x10] sm:$0xf] %vm731_vm1, %v950_v6  ;;  %v953_v14 = vpack.c.bf16 %v578_v7, %v578_v7  ;;  %v576_v15 = vmax.f32 %v464_v8, 0.0  ;;  %v485_v16 = vadd.f32 %v1010_v13, %v1191_v18  ;;  %v969_v19 = vpack.c.bf16 %v594_v11, %v594_v11 }
  0xe7   : > { %752 = vst.msk [vmem:[%s1201_s29 + $0x50] sm:$0xf] %vm731_vm1, %v966_v10  ;;  %v592_v20 = vmax.f32 %v528_v12, 0.0  ;;  %v549_v21 = vadd.f32 %v1026_v17, %v1191_v18  ;;  %v476_v22 = vpop.f32.mrf.mxu0  ;;  %v540_v26 = vpop.f32.mrf.mxu1 }
  0xe8   : > { %739 = vst.msk [vmem:[%s1201_s29 + $0x1c] sm:$0xf] %vm731_vm1, %v953_v14  ;;  %v951_v23 = vpack.c.bf16 %v576_v15, %v576_v15  ;;  %v581_v24 = vmax.f32 %v485_v16, 0.0  ;;  %v477_v25 = vadd.f32 %v1191_v18, %v476_v22  ;;  %755 = vst.msk [vmem:[%s1201_s29 + $0x5c] sm:$0xf] %vm731_vm1, %v969_v19  ;;  %v541_v29 = vadd.f32 %v1191_v18, %v540_v26 }
  0xe9   : > { %v967_v27 = vpack.c.bf16 %v592_v20, %v592_v20  ;;  %v597_v28 = vmax.f32 %v549_v21, 0.0  ;;  %v1011_v30 = vpop.f32.mrf.mxu0  ;;  %v1027_v34 = vpop.f32.mrf.mxu1 }
  0xea   : > { %737 = vst.msk [vmem:[%s1201_s29 + $0x14] sm:$0xf] %vm731_vm1, %v951_v23  ;;  %v956_v31 = vpack.c.bf16 %v581_v24, %v581_v24  ;;  %v579_v32 = vmax.f32 %v477_v25, 0.0  ;;  %v488_v33 = vadd.f32 %v1011_v30, %v1191_v18  ;;  %v595_v36 = vmax.f32 %v541_v29, 0.0 }
  0xeb   : > { %753 = vst.msk [vmem:[%s1201_s29 + $0x54] sm:$0xf] %vm731_vm1, %v967_v27  ;;  %v972_v35 = vpack.c.bf16 %v597_v28, %v597_v28  ;;  %v552_v37 = vadd.f32 %v1027_v34, %v1191_v18  ;;  %v479_v38 = vpop.f32.mrf.mxu0  ;;  %v543_v42 = vpop.f32.mrf.mxu1 }
  0xec   : > { %742 = vst.msk [vmem:[%s1201_s29 + $0x28] sm:$0xf] %vm731_vm1, %v956_v31  ;;  %v954_v39 = vpack.c.bf16 %v579_v32, %v579_v32  ;;  %v582_v40 = vmax.f32 %v488_v33, 0.0  ;;  %v480_v41 = vadd.f32 %v1191_v18, %v479_v38  ;;  %v970_v43 = vpack.c.bf16 %v595_v36, %v595_v36 }
  0xed   : > { %758 = vst.msk [vmem:[%s1201_s29 + $0x68] sm:$0xf] %vm731_vm1, %v972_v35  ;;  %v598_v44 = vmax.f32 %v552_v37, 0.0  ;;  %v544_v45 = vadd.f32 %v1191_v18, %v543_v42  ;;  %v1014_v46 = vpop.f32.mrf.mxu0  ;;  %v1030_v50 = vpop.f32.mrf.mxu1 }
  0xee   : > { %740 = vst.msk [vmem:[%s1201_s29 + $0x20] sm:$0xf] %vm731_vm1, %v954_v39  ;;  %v957_v47 = vpack.c.bf16 %v582_v40, %v582_v40  ;;  %v580_v48 = vmax.f32 %v480_v41, 0.0  ;;  %v501_v49 = vadd.f32 %v1014_v46, %v1191_v18  ;;  %756 = vst.msk [vmem:[%s1201_s29 + $0x60] sm:$0xf] %vm731_vm1, %v970_v43  ;;  %v565_v53 = vadd.f32 %v1030_v50, %v1191_v18 }
  0xef   : > { %v973_v51 = vpack.c.bf16 %v598_v44, %v598_v44  ;;  %v596_v52 = vmax.f32 %v544_v45, 0.0  ;;  %v492_v54 = vpop.f32.mrf.mxu0  ;;  %v556_v58 = vpop.f32.mrf.mxu1 }
  0xf0   : > { %743 = vst.msk [vmem:[%s1201_s29 + $0x2c] sm:$0xf] %vm731_vm1, %v957_v47  ;;  %v955_v55 = vpack.c.bf16 %v580_v48, %v580_v48  ;;  %v585_v56 = vmax.f32 %v501_v49, 0.0  ;;  %v493_v57 = vadd.f32 %v1191_v18, %v492_v54  ;;  %v601_v60 = vmax.f32 %v565_v53, 0.0 }
  0xf1   : > { %759 = vst.msk [vmem:[%s1201_s29 + $0x6c] sm:$0xf] %vm731_vm1, %v973_v51  ;;  %v971_v59 = vpack.c.bf16 %v596_v52, %v596_v52  ;;  %v557_v61 = vadd.f32 %v1191_v18, %v556_v58  ;;  %v1015_v62 = vpop.f32.mrf.mxu0  ;;  %v1031_v2 = vpop.f32.mrf.mxu1 }
  0xf2   : > { %741 = vst.msk [vmem:[%s1201_s29 + $0x24] sm:$0xf] %vm731_vm1, %v955_v55  ;;  %v960_v63 = vpack.c.bf16 %v585_v56, %v585_v56  ;;  %v583_v0 = vmax.f32 %v493_v57, 0.0  ;;  %v504_v1 = vadd.f32 %v1015_v62, %v1191_v18  ;;  %v976_v3 = vpack.c.bf16 %v601_v60, %v601_v60 }
  0xf3   : > { %757 = vst.msk [vmem:[%s1201_s29 + $0x64] sm:$0xf] %vm731_vm1, %v971_v59  ;;  %v599_v4 = vmax.f32 %v557_v61, 0.0  ;;  %v568_v5 = vadd.f32 %v1031_v2, %v1191_v18  ;;  %v495_v6 = vpop.f32.mrf.mxu0  ;;  %v559_v10 = vpop.f32.mrf.mxu1 }
  0xf4   : > { %746 = vst.msk [vmem:[%s1201_s29 + $0x38] sm:$0xf] %vm731_vm1, %v960_v63  ;;  %v958_v7 = vpack.c.bf16 %v583_v0, %v583_v0  ;;  %v586_v8 = vmax.f32 %v504_v1, 0.0  ;;  %v496_v9 = vadd.f32 %v1191_v18, %v495_v6  ;;  %762 = vst.msk [vmem:[%s1201_s29 + $0x78] sm:$0xf] %vm731_vm1, %v976_v3  ;;  %v560_v13 = vadd.f32 %v1191_v18, %v559_v10 }
  0xf5   : > { %v974_v11 = vpack.c.bf16 %v599_v4, %v599_v4  ;;  %v602_v12 = vmax.f32 %v568_v5, 0.0 }
  0xf6   : > { %744 = vst.msk [vmem:[%s1201_s29 + $0x30] sm:$0xf] %vm731_vm1, %v958_v7  ;;  %v961_v14 = vpack.c.bf16 %v586_v8, %v586_v8  ;;  %v584_v15 = vmax.f32 %v496_v9, 0.0  ;;  %v600_v17 = vmax.f32 %v560_v13, 0.0 }
  0xf7   : > { %760 = vst.msk [vmem:[%s1201_s29 + $0x70] sm:$0xf] %vm731_vm1, %v974_v11  ;;  %v977_v16 = vpack.c.bf16 %v602_v12, %v602_v12 }
  0xf8   : > { %747 = vst.msk [vmem:[%s1201_s29 + $0x3c] sm:$0xf] %vm731_vm1, %v961_v14  ;;  %v959_v19 = vpack.c.bf16 %v584_v15, %v584_v15  ;;  %v975_v20 = vpack.c.bf16 %v600_v17, %v600_v17 }
  0xf9   : > { %763 = vst.msk [vmem:[%s1201_s29 + $0x7c] sm:$0xf] %vm731_vm1, %v977_v16 }
  0xfa   : > { %745 = vst.msk [vmem:[%s1201_s29 + $0x34] sm:$0xf] %vm731_vm1, %v959_v19  ;;  %761 = vst.msk [vmem:[%s1201_s29 + $0x74] sm:$0xf] %vm731_vm1, %v975_v20 }
  0xfb PF: > { %s13_s14 = sadd.s32 1, %s1100_s14   ;;  %s1309_s12 = smov %s1096_s13 }
  0xfc   : > { %p10_p5 = scmp.ge.s32.totalorder %s13_s14, 4   ;;  %s1310_s13 = smov %s1312_s15 }
  0xfe   :  { %12 = sbr.rel (!%p10_p5) target bundleno = 2 (0x2), region = 68 }

</bundles_post_ra>
